<compile_context>
chip_gen: v5e
topology: v5e:2x2
jax: 0.10.0
libtpu: 0.0.40
codegen_flags: <defaults>
</compile_context>

<pallas_src>
import functools

import jax
import jax.numpy as jnp
from jax import lax
from jax.experimental import pallas as pl
from jax.experimental.pallas import tpu as pltpu


def _round_up(x: int, m: int) -> int:
    return ((x + m - 1) // m) * m


def _cdiv(a: int, b: int) -> int:
    return (a + b - 1) // b


# ---------------------------------------------------------------------------
# Kernel
# ---------------------------------------------------------------------------

def _fm_kernel(x_ref, o_ref, *, num_fields: int, embed_dim: int,
               batch_size: int, chunk: int):
    """x_ref: (tb, F*D) lane-dense block; o_ref: (tb, 1) f32.

    chunk == 128  -> vreg-aligned chunk adds + halving fold (needs D | 128 and
                     F*D % 128 == 0).
    chunk == D    -> one field slab per iteration (works for any F, D).
    """
    tb = x_ref.shape[0]
    fd = num_fields * embed_dim
    n_chunks = fd // chunk

    # Stage 1 (VALU): accumulate partial field sums and squared sums.
    # Per-chunk f32 upcast -> no full-block f32 temporary for bf16 inputs.
    c0 = x_ref[:, 0:chunk].astype(jnp.float32)
    acc = c0
    ssq = c0 * c0
    for c in range(1, n_chunks):
        xc = x_ref[:, c * chunk:(c + 1) * chunk].astype(jnp.float32)
        acc = acc + xc
        ssq = ssq + xc * xc

    # Stage 2: fold the accumulator width down to embed_dim (only runs on the
    # 128-wide chunk path).  Each halving step adds field groups that share the
    # same embedding coordinate (valid because embed_dim divides 128).
    w = chunk
    while w > embed_dim:
        h = w // 2
        acc = acc[:, :h] + acc[:, h:w]
        ssq = ssq[:, :h] + ssq[:, h:w]
        w = h

    # acc[b, d] == sum_f x[b, f, d];  ssq[b, d] == sum_f x[b, f, d] ** 2
    res = 0.5 * jnp.sum(acc * acc - ssq, axis=1, keepdims=True)   # (tb, 1)

    # Defensive mask for the partial last block: rows >= batch_size contain
    # unspecified data (their outputs are clipped by Pallas anyway).
    rows = lax.broadcasted_iota(jnp.int32, (tb, 1), 0)
    valid = batch_size - pl.program_id(0) * tb
    res = jnp.where(rows < valid, res, 0.0)

    o_ref[...] = res.astype(o_ref.dtype)


# ---------------------------------------------------------------------------
# Wrapper
# ---------------------------------------------------------------------------

def _vmem_capacity_bytes() -> int:
    try:
        info = pltpu.get_tpu_info()
        cap = getattr(info, "vmem_capacity_bytes", None)
        if cap:
            return int(cap)
    except Exception:
        pass
    return 64 << 20   # conservative default (v7x-sized)


def factorization_machine(embeddings: jax.Array, *,
                          batch_tile: int | None = None) -> jax.Array:
    """embeddings: (B, F, D) float32/bfloat16 -> (B, 1) float32."""
    B, F, D = embeddings.shape
    FD = F * D
    itemsize = jnp.dtype(embeddings.dtype).itemsize
    pack = 8 * max(1, 4 // itemsize)          # sublane packing: 8 f32 / 16 bf16

    # Static chunking strategy.
    if FD % 128 == 0 and 128 % D == 0 and D < 128:
        chunk = 128                           # vreg-aligned fast path
    else:
        chunk = D                             # generic field-slab path

    vmem_cap = _vmem_capacity_bytes()

    # Per-batch-row VMEM footprint: double-buffered input block, double-
    # buffered output block ((tb,1) pads to (tb,128) lanes in VMEM), and f32
    # accumulators / temporaries (acc, ssq, chunk, expr).
    in_row = FD * itemsize
    out_row = 128 * 4
    tmp_row = 4 * _round_up(chunk, 128) * 4
    per_row = 2 * in_row + 2 * out_row + tmp_row

    if batch_tile is None:
        target = (16 << 20) if vmem_cap > (64 << 20) else (8 << 20)
        batch_tile = max(pack, (target // per_row) // pack * pack)
        # Keep several grid steps: pipelining headroom everywhere, and >=2
        # steps so both v7x TensorCores get work on the 'parallel' axis.
        batch_tile = min(batch_tile, _round_up(_cdiv(B, 8), pack))
    batch_tile = max(pack, _round_up(batch_tile, pack))

    grid = (_cdiv(B, batch_tile),)

    vmem_needed = batch_tile * per_row
    vmem_limit = int(min(max(vmem_needed * 3 // 2 + (2 << 20), 16 << 20),
                         vmem_cap * 3 // 4))

    # Contiguous reshape (B, F, D) -> (B, F*D): metadata-only, no extra HBM pass.
    x = embeddings.reshape(B, FD)

    kernel = functools.partial(_fm_kernel, num_fields=F, embed_dim=D,
                               batch_size=B, chunk=chunk)

    out = pl.pallas_call(
        kernel,
        out_shape=jax.ShapeDtypeStruct((B, 1), jnp.float32),
        grid_spec=pltpu.PrefetchScalarGridSpec(
            num_scalar_prefetch=0,
            grid=grid,
            in_specs=[pl.BlockSpec((batch_tile, FD), lambda b: (b, 0))],
            out_specs=pl.BlockSpec((batch_tile, 1), lambda b: (b, 0)),
        ),
        compiler_params=pltpu.CompilerParams(
            dimension_semantics=("parallel",),
            vmem_limit_bytes=vmem_limit,
        ),
        cost_estimate=pl.CostEstimate(
            flops=6 * B * FD,
            transcendentals=0,
            bytes_accessed=B * FD * itemsize + B * 4,
        ),
    )(x)
    return out


# ---------------------------------------------------------------------------
# Reference + self-test
# ---------------------------------------------------------------------------

def _reference_fm(embeddings: jnp.ndarray) -> jnp.ndarray:
    e = embeddings.astype(jnp.float32)
    square_of_sum = jnp.sum(e, axis=1) ** 2
    sum_of_square = jnp.sum(e ** 2, axis=1)
    return 0.5 * jnp.sum(square_of_sum - sum_of_square, axis=1, keepdims=True)


if __name__ == "__main__":
    key = jax.random.PRNGKey(0)
    k1, k2, k3, k4 = jax.random.split(key, 4)

    # Case 1: vreg-aligned chunk + fold path (F*D == 128, D | 128), f32.
    B, F, D = 16, 4, 32
    emb = jax.random.normal(k1, (B, F, D), dtype=jnp.float32)
    out = jax.block_until_ready(factorization_machine(emb))
    assert out.shape == (B, 1), out.shape
    assert jnp.allclose(out, _reference_fm(emb), atol=1e-4, rtol=1e-4)

    # Case 2: generic field-slab path (F*D % 128 != 0), partial last block.
    B2, F2, D2 = 12, 3, 64
    emb2 = jax.random.normal(k2, (B2, F2, D2), dtype=jnp.float32)
    out2 = jax.block_until_ready(factorization_machine(emb2))
    assert out2.shape == (B2, 1), out2.shape
    assert jnp.allclose(out2, _reference_fm(emb2), atol=1e-4, rtol=1e-4)

    # Case 3: bf16 inputs (per-chunk f32 upcast and accumulation).
    emb3 = jax.random.normal(k3, (B, F, D), dtype=jnp.float32).astype(jnp.bfloat16)
    out3 = jax.block_until_ready(factorization_machine(emb3))
    assert out3.shape == (B, 1), out3.shape
    assert jnp.allclose(out3, _reference_fm(emb3), atol=1e-3, rtol=1e-3)

    # Case 4: D a multiple of 128 (aligned slab path), B not tile-aligned.
    B4, F4, D4 = 10, 5, 128
    emb4 = jax.random.normal(k4, (B4, F4, D4), dtype=jnp.float32)
    out4 = jax.block_until_ready(factorization_machine(emb4))
    assert out4.shape == (B4, 1), out4.shape
    assert jnp.allclose(out4, _reference_fm(emb4), atol=1e-4, rtol=1e-4)

    print("KERNEL_OK")
</pallas_src>

<mosaic_0001>
module attributes {stable_mosaic.version = 11 : i64} {
  func.func @_fm_kernel(%arg0: i32, %arg1: memref<8x128xf32, #tpu.memory_space<vmem>>, %arg2: memref<8x1xf32, #tpu.memory_space<vmem>>) attributes {dimension_semantics = [#tpu.dimension_semantics<parallel>], iteration_bounds = array<i64: 2>, scalar_prefetch = 0 : i64, scratch_operands = 0 : i64, tpu.core_type = #tpu.core_type<tc>, window_params = [{transform_indices = @transform_0, window_bounds = array<i64: 8, 128>}, {transform_indices = @transform_1, window_bounds = array<i64: 8, 1>}]} {
    %c0 = arith.constant 0 : index
    %c0_0 = arith.constant 0 : index
    %0 = vector.load %arg1[%c0, %c0_0] : memref<8x128xf32, #tpu.memory_space<vmem>>, vector<8x128xf32>
    %1 = arith.mulf %0, %0 : vector<8x128xf32>
    %2 = vector.extract_strided_slice %0 {offsets = [0, 0], sizes = [8, 64], strides = [1, 1]} : vector<8x128xf32> to vector<8x64xf32>
    %3 = vector.extract_strided_slice %0 {offsets = [0, 64], sizes = [8, 64], strides = [1, 1]} : vector<8x128xf32> to vector<8x64xf32>
    %4 = arith.addf %2, %3 : vector<8x64xf32>
    %5 = vector.extract_strided_slice %1 {offsets = [0, 0], sizes = [8, 64], strides = [1, 1]} : vector<8x128xf32> to vector<8x64xf32>
    %6 = vector.extract_strided_slice %1 {offsets = [0, 64], sizes = [8, 64], strides = [1, 1]} : vector<8x128xf32> to vector<8x64xf32>
    %7 = arith.addf %5, %6 : vector<8x64xf32>
    %8 = vector.extract_strided_slice %4 {offsets = [0, 0], sizes = [8, 32], strides = [1, 1]} : vector<8x64xf32> to vector<8x32xf32>
    %9 = vector.extract_strided_slice %4 {offsets = [0, 32], sizes = [8, 32], strides = [1, 1]} : vector<8x64xf32> to vector<8x32xf32>
    %10 = arith.addf %8, %9 : vector<8x32xf32>
    %11 = vector.extract_strided_slice %7 {offsets = [0, 0], sizes = [8, 32], strides = [1, 1]} : vector<8x64xf32> to vector<8x32xf32>
    %12 = vector.extract_strided_slice %7 {offsets = [0, 32], sizes = [8, 32], strides = [1, 1]} : vector<8x64xf32> to vector<8x32xf32>
    %13 = arith.addf %11, %12 : vector<8x32xf32>
    %14 = arith.mulf %10, %10 : vector<8x32xf32>
    %15 = arith.subf %14, %13 : vector<8x32xf32>
    %cst = arith.constant dense<0.000000e+00> : vector<8xf32>
    %16 = vector.multi_reduction <add>, %15, %cst [1] : vector<8x32xf32> to vector<8xf32>
    %17 = vector.shape_cast %16 : vector<8xf32> to vector<8x1xf32>
    %cst_1 = arith.constant 5.000000e-01 : f32
    %18 = vector.broadcast %cst_1 : f32 to vector<8x1xf32>
    %19 = arith.mulf %18, %17 : vector<8x1xf32>
    %20 = tpu.iota {dimensions = array<i32: 0>} : vector<8x1xi32>
    %c8_i32 = arith.constant 8 : i32
    %21 = arith.muli %arg0, %c8_i32 : i32
    %c16_i32 = arith.constant 16 : i32
    %22 = arith.subi %c16_i32, %21 : i32
    %23 = vector.broadcast %22 : i32 to vector<8x1xi32>
    %24 = arith.cmpi slt, %20, %23 : vector<8x1xi32>
    %cst_2 = arith.constant 0.000000e+00 : f32
    %25 = vector.broadcast %cst_2 : f32 to vector<8x1xf32>
    %26 = arith.select %24, %19, %25 : vector<8x1xi1>, vector<8x1xf32>
    %c0_3 = arith.constant 0 : index
    %c0_4 = arith.constant 0 : index
    %27 = vector.load %arg2[%c0_3, %c0_4] : memref<8x1xf32, #tpu.memory_space<vmem>>, vector<8x1xf32>
    tpu.vector_store %arg2[%c0_3, %c0_4], %26 {strides = array<i32>} : memref<8x1xf32, #tpu.memory_space<vmem>>, vector<8x1xf32>,
    return
  }
  func.func @transform_0(%arg0: i32) -> (i32, i32) {
    %c0_i32 = arith.constant 0 : i32
    %c0_i32_0 = arith.constant 0 : i32
    return %arg0, %c0_i32 : i32, i32
  }
  func.func @transform_1(%arg0: i32) -> (i32, i32) {
    %c0_i32 = arith.constant 0 : i32
    %c0_i32_0 = arith.constant 0 : i32
    return %arg0, %c0_i32 : i32, i32
  }
}

</mosaic_0001>

<bundles_post_ra>
// kernel: tpu_custom_call.1
= control target key start
LH: loop header
LB: loop body
LE: loop exit
PB: predicated region body
PF: predicated region fallthrough
CT: control target
= control target key end

     0   :  { %6 = vsyncpa [#allocation3], 0  ;;  %s462_s0 = inlined_call_operand.hbm [shape: f32[16,128], index: 0, kind: input, shape index: {}]   ;;  %s463_s1 = inlined_call_operand.vmem [shape: f32[16,1], index: 1, kind: output, shape index: {}]  }
   0x1   :  { %8 = vsyncpa [#allocation3 + $0x1], 0  ;;  %s367_s6 = smov 0   ;;  %s369_s7 = smov 0  }
   0x2   :  { %s371_s8 = smov 0   ;;  %s373_s9 = smov 0  }
   0x3 LB: > { %s386_s10 = sadd.s32 4294967295, %s353_s9   ;;  %s389_s11 = sadd.s32 1, %s353_s9   ;;  %s353_s9 = sphi %s373_s9, %s470_s9   ;;  %s349_s8 = sphi %s371_s8, %s469_s8   ;;  %s345_s7 = sphi %s369_s7, %s468_s7   ;;  %s341_s6 = sphi %s367_s6, %s467_s6  }
   0x4   : > { %s18_s12 = ssub.s32 %s353_s9, %s389_s11  ;;  %s21_s13 = sadd.s32 1, %s349_s8 }
   0x5   : > { %p19_p0 = scmp.eq.s32.totalorder %s18_s12, 0  ;;  %p28_p1 = scmp.ne.s32.totalorder %s349_s8, %s345_s7 }
   0x6   : > { %p29_p2 = scmp.eq.s32.totalorder %s353_s9, 0  ;;  %p34_p3 = scmp.ne.s32.totalorder %s345_s7, %s341_s6 }
   0x7   : > { %s399_s14 = scalar_select %p19_p0, %s349_s8, %s21_s13  }
   0x8   : > { %p401_p4 = por %p29_p2, %p28_p1  ;;  %p35_p5 = scmp.eq.s32.totalorder %s386_s10, 0 }
   0x9   : > { %p254_p6 = scmp.lt.s32.totalorder %s353_s9, 2  ;;  %s84_s17 = sand.u32 1, %s349_s8  }
   0xa   : > { %p407_p7 = por %p35_p5, %p34_p3  ;;  %s240_s18 = sshll.u32 %s84_s17, 3 }
   0xb   : > { %s241_s19 = sshll.u32 %s353_s9, 3  ;;  %s88_s23 = scalar_lea.vmem [#allocation2], %s240_s18 }
   0xc   : > { %s92_s22 = scalar_lea.hbm %s462_s0, %s241_s19  ;;  %s96_s24 = sshll.u32 %s88_s23, 4  ;;  %s97_s24 = int_to_ptr.vmem [resolvable:$true] %s96_s24 }
   0xd   : > { %s94_s25 = sshll.u32 %s92_s22, 4  ;;  %p418_p8 = pnand %p254_p6, %p401_p4  ;;  %s95_s25 = int_to_ptr.hbm [resolvable:$true] %s94_s25 }
   0xe   : > { %p242_p9 = scmp.ge.s32.totalorder %s353_s9, 1  ;;  %p101_p10 = scmp.lt.s32.totalorder %s353_s9, 3 }
   0xf   : > { %s85_s27 = scalar_lea.sflag [#allocation3], %s84_s17  ;;  %s289_s28 = sshra.s32 %s95_s25, 4  ;;  %s290_s28 = int_to_ptr.hbm [resolvable:$true] %s289_s28 }
  0x10   : > { %s291_s29 = scalar_lea.hbm %s290_s28, 8  ;;  %p293_p12 = pneg %p418_p8 }
  0x11   : > { %p292_p11 = scmp.ne.s32.totalorder %s290_s28, %s291_s29  ;;  %s296_s3 = scalar_lea.hbm %s462_s0, 16 }
  0x12   : > { %p297_p1 = scmp.lt.s32.totalorder %s290_s28, %s462_s0  ;;  %p298_p2 = scmp.lt.s32.totalorder %s296_s3, %s291_s29 }
  0x13   : > { %p294_p13 = pnand %p293_p12, %p292_p11 }
  0x14   : > { %p299_p3 = por %p298_p2, %p297_p1 }
  0x15   : > { %p295_p0 = pneg %p294_p13 }
  0x17   : > { %p300_p4 = pnand %p299_p3, %p295_p0 }
  0x19   : > { %303 = shalt.err (!%p300_p4)
}
  0x1a   : > { %253 = dma.hbm_to_vmem [thread:$0]  (!%p418_p8), %s95_s25, 128, %s97_s24, %s85_s27  }
  0x1b   : > { %p102_p5 = pnand %p242_p9, %p101_p10 }
  0x1c   : > { %s107_s6 = sand.u32 (!%p102_p5), 1, %s345_s7  }
  0x1d   : > { %105 = sbr.rel (%p102_p5) target bundleno = 401 (0x191), region = 24  ;;  %s243_s12 = sshll.u32 (!%p102_p5), %s107_s6, 3 }
  0x1e   : > { %s108_s13 = scalar_lea.sflag (!%p102_p5), [#allocation3], %s107_s6  ;;  %s111_s15 = scalar_lea.vmem (!%p102_p5), [#allocation2], %s243_s12 }
  0x22   : > { %336 = dma.done.wait (%p407_p7), %s108_s13, 128  }
  0x23   : > { %338 = vsyncadd (%p407_p7), %s108_s13, 4294967168  ;;  %v134_v0 = vld [vmem:[%s111_s15] sm:$0xff]  ;;  %s355_s17 = smov 64   ;;  %s356_s9 = smov 96   ;;  %vm158_vm0 = vcmask 261120   ;;  %v163_v13 = vlaneseq  ;;  %vm170_vm2 = vcmask 7168  }
  0x24   : > { %137 = vrot.lane.b32.xlu0 %v134_v0, %s355_s17  ;;  %v135_v1 = vmul.f32 %v134_v0, %v134_v0  ;;  %p130_p6 = scmp.lt.s32.totalorder %s386_s10, 1  ;;  %s245_s16 = sshll.u32 %s386_s10, 3 }
  0x25   : > { %s166_s18 = ssub.s32 16, %s245_s16  ;;  %v164_v14 = vshrl.u32 %v163_v13, 7 }
  0x26   : > { %s472_s10 = smov (!%p130_p6, %s386_s10), 1  ;;  %v167_v15 = vstv %s166_s18 }
  0x27   : > { %s244_s19 = sshll.u32 %s472_s10, 3  ;;  %vm168_vm1 = vcmp.lt.s32.totalorder %v164_v14, %v167_v15 }
  0x28   : > { %s133_s22 = scalar_lea.vmem %s463_s1, %s244_s19 }
  0x2c   : > { %142 = vrot.lane.b32.xlu0 %v135_v1, %s355_s17 }
  0x96   : > { %v138_v2 = vpop.permute.xlu0 %137 }
  0x97   : > { %v140_v3 = vadd.f32 %v138_v2, %v134_v0 }
  0x99   : > { %147 = vrot.lane.b32.xlu1 %v140_v3, %s356_s9 }
  0x9e   : > { %v143_v4 = vpop.permute.xlu0 %142 }
  0x9f   : > { %v145_v5 = vadd.f32 %v143_v4, %v135_v1 }
  0xa1   : > { %152 = vrot.lane.b32.xlu1 %v145_v5, %s356_s9 }
 0x10b   : > { %v148_v6 = vpop.permute.xlu1 %147 }
 0x10c   : > { %v150_v7 = vadd.f32 %v148_v6, %v140_v3 }
 0x10e   : > { %v156_v9 = vmul.f32 %v150_v7, %v150_v7 }
 0x113   : > { %v153_v8 = vpop.permute.xlu1 %152 }
 0x114   : > { %v155_v10 = vadd.f32 %v153_v8, %v145_v5 }
 0x116   : > { %v157_v11 = vsub.f32 %v156_v9, %v155_v10 }
 0x118   : > { %v159_v12 = vsel %vm158_vm0, %v157_v11, 0.0 }
 0x119   : > { %160 = vadd.xlane.f32.xlu2 %v159_v12 }
 0x18c   : > { %v161_v16 = vpop.xlane.xlu2 %160 }
 0x18d   : > { %v162_v17 = vmul.f32 0.5, %v161_v16 }
 0x18f   : > { %v169_v18 = vsel %vm168_vm1, %v162_v17, 0.0 }
 0x190   : > { %171 = vst.msk [vmem:[%s133_s22] sm:$0xff] %vm170_vm2, %v169_v18 }
 0x191 PF: > { %p11_p7 = scmp.ge.s32.totalorder %s389_s11, 4   ;;  %s467_s6 = smov %s345_s7 }
 0x192   : > { %s468_s7 = smov %s349_s8  ;;  %s469_s8 = smov %s399_s14 }
 0x193   : > { %s470_s9 = smov %s389_s11  ;;  %13 = sbr.rel (!%p11_p7) target bundleno = 3 (0x3), region = 64 }
 0x198   :  { %191 = vsyncpa [#allocation3], 1 }
 0x199   :  { %193 = vsyncpa [#allocation3 + $0x1], 1 }

</bundles_post_ra>
